<compile_context>
chip_gen: v5e
topology: v5e:2x2
jax: 0.10.0
libtpu: 0.0.40
codegen_flags: <defaults>
</compile_context>

<pallas_src>
import jax
import jax.numpy as jnp
from jax import lax
from jax.experimental import pallas as pl
from jax.experimental.pallas import tpu as pltpu

# Default Rational(version='A', degrees=(5,4)) init (leaky_relu approximation).
RAT_NUM = (0.02996348, 0.61690165, 2.37539147, 3.06608078, 1.52474449, 0.25281987)
RAT_DEN = (1.19160814, 4.40811795, 0.91111034, 0.34885983)
BN_EPS = 1e-5

_LANE = 128
_SUBLANE = 16     # bf16-safe sublane multiple for row tiles


# ------------------------------ small helpers --------------------------------

def _round_up(x, m):
    return ((x + m - 1) // m) * m


def _cdiv(a, b):
    return -(-a // b)


def _rational_num_den(x):
    """Estrin-split P(x), 1+|Q(x)| for the default Rational('A', (5,4))."""
    a0, a1, a2, a3, a4, a5 = RAT_NUM
    b1, b2, b3, b4 = RAT_DEN
    x2 = x * x
    x4 = x2 * x2
    num = (a0 + a1 * x) + x2 * (a2 + a3 * x) + x4 * (a4 + a5 * x)
    den = 1.0 + jnp.abs(x * (b1 + b2 * x) + x2 * (b3 * x + b4 * x2))
    return num, den


def _rational_kernel(x):
    num, den = _rational_num_den(x)
    return num * pl.reciprocal(den, approx=True)   # EUP slot; den >= 1 so it is safe


def _rational_ref(x):
    num, den = _rational_num_den(x)
    return num / den


def _fold_bn(bn):
    scale = bn['gamma'] / jnp.sqrt(bn['var'] + BN_EPS)
    bias = bn['beta'] - bn['mean'] * scale
    return scale.astype(jnp.float32), bias.astype(jnp.float32)


def _tpu_vmem_bytes():
    try:
        return int(pltpu.get_tpu_info().vmem_capacity_bytes)
    except Exception:
        return 64 << 20          # assume the smallest per-core VMEM (v7x) when unknown


def _choose_tm(m_out, n_batch, row_bytes, fixed_bytes, vmem_cap):
    """Row-tile size: as large as the per-generation VMEM budget allows."""
    big = vmem_cap >= (96 << 20)              # v5e / v6e: 128 MiB; v7x: 64 MiB per TC
    budget = (20 << 20) if big else (10 << 20)
    tm_cap = 1024 if big else 512
    avail = max(budget - fixed_bytes, 2 << 20)
    tm = max(_SUBLANE, min(tm_cap, avail // max(row_bytes, 1)))
    tm = (tm // _SUBLANE) * _SUBLANE
    # guarantee >= 2 total grid steps so ("parallel","parallel") can shard across
    # the two TensorCores of a v7x chip even for a single image
    min_blocks = 1 if n_batch >= 2 else 2
    blocks = max(min_blocks, _cdiv(m_out, tm))
    tm = min(tm, _round_up(_cdiv(m_out, blocks), _SUBLANE))
    tm = max(tm, _SUBLANE)
    m_pad = _round_up(max(m_out, tm), tm)
    return tm, m_pad


def _compiler_params(est_bytes, vmem_cap):
    big = vmem_cap >= (96 << 20)
    ceiling = (100 << 20) if big else (56 << 20)   # leave headroom on v7x's 64 MiB
    limit = int(max(32 << 20, min(ceiling, est_bytes + (8 << 20))))
    return pltpu.CompilerParams(
        dimension_semantics=("parallel", "parallel"),
        vmem_limit_bytes=limit)


def _const_spec(block_shape):
    """BlockSpec for operands whose block never changes across the grid
    (weight stack / bias): single-buffer them to save VMEM."""
    zeros = (0,) * len(block_shape)
    index_map = lambda n, b: zeros
    try:
        return pl.BlockSpec(block_shape, index_map, pipeline_mode=pl.Buffered(1))
    except Exception:   # pipeline_mode / Buffered(1) unavailable -> default buffering
        return pl.BlockSpec(block_shape, index_map)


# ----------------------------- Pallas kernels --------------------------------

def _make_conv_kernel(tm, tload, tap_offsets, mode):
    """Conv as len(tap_offsets) shifted MXU matmuls over a per-image flattened
    NHWC slab resident in VMEM, with fused BN-bias + rational epilogue.

    mode: 'plain' (conv1), 'res' (conv2 + identity residual),
          'sc' (conv2 + fused 1x1-conv/BN shortcut matmul)."""

    def kernel(x_ref, w_ref, b_ref, *rest):
        o_ref = rest[-1]
        blk = pl.program_id(1)
        base = pl.multiple_of(blk * tm, _SUBLANE)
        # One aligned load of all rows this tile needs (incl. the tap halo);
        # every tap shift below is a static slice of this value.
        xs = x_ref[0, pl.ds(base, tload), :]

        if mode == "res":
            acc = rest[0][0].astype(jnp.float32)             # identity residual pre-add
        elif mode == "sc":
            acc = jnp.dot(rest[0][0], rest[1][...],          # fused 1x1-conv shortcut
                          preferred_element_type=jnp.float32)
        else:
            acc = None

        for i, off in enumerate(tap_offsets):
            d = jnp.dot(xs[off:off + tm, :], w_ref[i],
                        preferred_element_type=jnp.float32)
            acc = d if acc is None else acc + d

        y = acc + b_ref[...]
        o_ref[0] = _rational_kernel(y).astype(o_ref.dtype)

    return kernel


def _conv_pallas(x_slab, w_stack, bias, tap_offsets, m_out, out_dtype,
                 res=None, sc=None, wsc=None):
    """Run one fused conv(+residual)+BN+rational pass.

    x_slab : (N, R, Cin)      per-image flattened, spatially padded NHWC slab
    w_stack: (T, Cin, CoutP)  BN-folded tap weights (CoutP = round_up(Cout,128))
    bias   : (1, CoutP)       BN bias (downsample: b2 + bsc)
    res    : (N, M, CoutP)    identity residual laid out on the output grid
    sc,wsc : (N, M, Cin_sc), (Cin_sc, CoutP)  fused 1x1-conv shortcut
    returns (N, M_pad, CoutP) in out_dtype."""
    n, r_have, cin_eff = x_slab.shape
    t, _, cout_pad = w_stack.shape
    dt_in = x_slab.dtype.itemsize
    dt_w = w_stack.dtype.itemsize
    odt = jnp.dtype(out_dtype).itemsize
    max_off = max(tap_offsets)
    vmem_cap = _tpu_vmem_bytes()

    fixed = (2 * (r_have + 2 * max_off) * cin_eff * dt_in      # resident image slab
             + 2 * t * cin_eff * cout_pad * dt_w               # tap weights
             + 8 * cout_pad * 4)
    row_bytes = 2 * cout_pad * odt + 2 * cin_eff * dt_in
    if res is not None:
        row_bytes += 2 * res.shape[-1] * res.dtype.itemsize
    if sc is not None:
        row_bytes += 2 * sc.shape[-1] * sc.dtype.itemsize

    tm, m_pad = _choose_tm(m_out, n, row_bytes, fixed, vmem_cap)
    tload = tm + _round_up(max_off, _SUBLANE)
    r_need = max(r_have, m_pad - tm + tload)
    x_slab = jnp.pad(x_slab, ((0, 0), (0, r_need - r_have), (0, 0)))

    mode = "res" if res is not None else ("sc" if sc is not None else "plain")
    kernel = _make_conv_kernel(tm, tload, tap_offsets, mode)

    in_specs = [
        pl.BlockSpec((1, r_need, cin_eff), lambda nn, bb: (nn, 0, 0)),   # whole image slab
        _const_spec((t, cin_eff, cout_pad)),                             # tap weights
        _const_spec((1, cout_pad)),                                      # bias
    ]
    args = [x_slab, w_stack, bias]
    extra_bytes = 0
    sc_k = 0
    if res is not None:
        res = jnp.pad(res, ((0, 0), (0, m_pad - res.shape[1]), (0, 0)))
        in_specs.append(pl.BlockSpec((1, tm, res.shape[-1]), lambda nn, bb: (nn, bb, 0)))
        args.append(res)
        extra_bytes = res.size * res.dtype.itemsize
    if sc is not None:
        sc = jnp.pad(sc, ((0, 0), (0, m_pad - sc.shape[1]), (0, 0)))
        in_specs.append(pl.BlockSpec((1, tm, sc.shape[-1]), lambda nn, bb: (nn, bb, 0)))
        in_specs.append(_const_spec(wsc.shape))
        args += [sc, wsc]
        extra_bytes = sc.size * sc.dtype.itemsize + wsc.size * wsc.dtype.itemsize
        sc_k = wsc.shape[0]

    flops = 2 * n * m_pad * cout_pad * (t * cin_eff + sc_k)
    bytes_accessed = (x_slab.size * dt_in + w_stack.size * dt_w + bias.size * 4
                      + extra_bytes + n * m_pad * cout_pad * odt)
    est_vmem = fixed + tm * row_bytes + 2 * tload * cin_eff * 4

    out = pl.pallas_call(
        kernel,
        out_shape=jax.ShapeDtypeStruct((n, m_pad, cout_pad), out_dtype),
        grid=(n, m_pad // tm),
        in_specs=in_specs,
        out_specs=pl.BlockSpec((1, tm, cout_pad), lambda nn, bb: (nn, bb, 0)),
        compiler_params=_compiler_params(est_vmem, vmem_cap),
        cost_estimate=pl.CostEstimate(flops=int(flops),
                                      transcendentals=int(n * m_pad * cout_pad),
                                      bytes_accessed=int(bytes_accessed)),
    )(*args)
    return out


# ------------------------------ JAX glue -------------------------------------

def _space_to_depth_weights(w_hwio):
    """(3,3,Cin,Cout) stride-2 taps -> (4, 4*Cin, Cout) taps of the equivalent
    2x2 stride-1 conv over the space-to-depth (phase-stacked) input."""
    wz = jnp.pad(w_hwio, ((0, 1), (0, 1), (0, 0), (0, 0)))     # tap index 3 -> zero
    taps = []
    for qh in (0, 1):
        for qw in (0, 1):
            rows = [wz[2 * qh + rh, 2 * qw + rw] for rh in (0, 1) for rw in (0, 1)]
            taps.append(jnp.concatenate(rows, axis=0))          # (4*Cin, Cout)
    return jnp.stack(taps, axis=0)


def rational_basic_block_forward_nhwc(x, params, stride, downsample,
                                      matmul_dtype=jnp.bfloat16):
    """RationalBasicBlock forward with NHWC activations end to end."""
    mm = jnp.dtype(matmul_dtype)
    n, h, w, cin = x.shape
    cout = params['w1'].shape[0]
    assert cout % 4 == 0, "multi_variant_rationals requires planes_out % 4 == 0"
    ho, wo = h // stride, w // stride
    # lane-dense output tiles; wasteful only for toy Cout < 128 (fine for real widths)
    cout_pad = _round_up(cout, _LANE)

    x = x.astype(jnp.float32)

    # ---------------- conv1 (3x3, stride) + bn1 + rational -------------------
    s1, b1 = _fold_bn(params['bn1'])
    w1 = jnp.transpose(params['w1'], (2, 3, 1, 0))              # HWIO (3,3,Cin,Cout)
    xp = jnp.pad(x, ((0, 0), (1, 1), (1, 1), (0, 0)))           # spatial pad = 1
    if stride == 1:
        k1, cin1 = 3, cin
        slab1 = xp.astype(mm)                                    # (N, H+2, W+2, Cin)
        wt1 = w1.reshape(9, cin, cout)
    else:
        assert stride == 2 and h % 2 == 0 and w % 2 == 0
        # space-to-depth: stride-2 3x3 conv == stride-1 2x2 conv on phase-stacked input
        k1, cin1 = 2, 4 * cin
        slab1 = jnp.concatenate(
            [xp[:, rh::2, rw::2, :] for rh in (0, 1) for rw in (0, 1)],
            axis=-1).astype(mm)                                  # (N, Ho+1, Wo+1, 4*Cin)
        wt1 = _space_to_depth_weights(w1)

    hin1, win1 = ho + k1 - 1, wo + k1 - 1
    wt1 = jnp.pad(wt1 * s1[None, None, :],
                  ((0, 0), (0, 0), (0, cout_pad - cout))).astype(mm)
    b1p = jnp.pad(b1, (0, cout_pad - cout)).reshape(1, cout_pad)
    taps1 = [kh * win1 + kw for kh in range(k1) for kw in range(k1)]

    act1 = _conv_pallas(slab1.reshape(n, hin1 * win1, cin1), wt1, b1p,
                        taps1, ho * win1, mm)
    act1 = act1[:, :ho * win1, :].reshape(n, ho, win1, cout_pad)[:, :, :wo, :cout]

    # -------------- conv2 (3x3, stride 1) + bn2 + shortcut + rational --------
    s2, b2 = _fold_bn(params['bn2'])
    wt2 = jnp.transpose(params['w2'], (2, 3, 1, 0)).reshape(9, cout, cout)
    wt2 = jnp.pad(wt2 * s2[None, None, :],
                  ((0, 0), (0, 0), (0, cout_pad - cout))).astype(mm)

    hin2, win2 = ho + 2, wo + 2
    slab2 = jnp.pad(act1, ((0, 0), (1, 1), (1, 1), (0, 0)))      # cheap bf16 re-pad glue
    slab2 = slab2.reshape(n, hin2 * win2, cout)
    taps2 = [kh * win2 + kw for kh in range(3) for kw in range(3)]
    m2 = ho * win2

    if downsample:
        ssc, bsc = _fold_bn(params['bnsc'])
        wsc = params['wsc'][:, :, 0, 0].T * ssc[None, :]                       # (Cin, Cout)
        wsc = jnp.pad(wsc, ((0, 0), (0, cout_pad - cout))).astype(mm)
        bias2 = jnp.pad(b2 + bsc, (0, cout_pad - cout)).reshape(1, cout_pad)
        sc = x[:, ::stride, ::stride, :].astype(mm)                             # (N,Ho,Wo,Cin)
        sc = jnp.pad(sc, ((0, 0), (0, 0), (0, win2 - wo), (0, 0)))
        sc = sc.reshape(n, m2, cin)
        out = _conv_pallas(slab2, wt2, bias2, taps2, m2, mm, sc=sc, wsc=wsc)
    else:
        assert stride == 1 and cin == cout
        bias2 = jnp.pad(b2, (0, cout_pad - cout)).reshape(1, cout_pad)
        res = jnp.pad(x.astype(mm),
                      ((0, 0), (0, 0), (0, win2 - wo), (0, cout_pad - cout)))
        res = res.reshape(n, m2, cout_pad)
        out = _conv_pallas(slab2, wt2, bias2, taps2, m2, mm, res=res)

    out = out[:, :m2, :].reshape(n, ho, win2, cout_pad)[:, :, :wo, :cout]
    return out


def rational_basic_block_forward(x_nchw, params, stride, downsample,
                                 matmul_dtype=jnp.bfloat16):
    """NCHW (PyTorch convention) wrapper around the NHWC core."""
    # TODO(synk): in a full network keep activations NHWC end to end and call
    # rational_basic_block_forward_nhwc directly; these transposes are only kept
    # for PyTorch-parity at the demo boundary.
    x = jnp.transpose(x_nchw, (0, 2, 3, 1))
    out = rational_basic_block_forward_nhwc(x, params, stride, downsample, matmul_dtype)
    return jnp.transpose(out, (0, 3, 1, 2))


# -------------------------- pure-JAX reference -------------------------------

def _ref_forward(x_nchw, params, stride, downsample):
    def conv(v, wt, s, pad):
        return lax.conv_general_dilated(
            v, wt, (s, s), ((pad, pad), (pad, pad)),
            dimension_numbers=('NCHW', 'OIHW', 'NCHW'))

    def bn(v, p):
        scale = p['gamma'] / jnp.sqrt(p['var'] + BN_EPS)
        bias = p['beta'] - p['mean'] * scale
        return v * scale[None, :, None, None] + bias[None, :, None, None]

    out = _rational_ref(bn(conv(x_nchw, params['w1'], stride, 1), params['bn1']))
    out = bn(conv(out, params['w2'], 1, 1), params['bn2'])
    sc = bn(conv(x_nchw, params['wsc'], stride, 0), params['bnsc']) if downsample else x_nchw
    return _rational_ref(out + sc)


# ------------------------------ parameters -----------------------------------

def init_params(key, planes_in, planes_out, downsample):
    keys = jax.random.split(key, 6)

    def bn_params(k):
        k1, k2, k3, k4 = jax.random.split(k, 4)
        return dict(
            gamma=1.0 + 0.1 * jax.random.normal(k1, (planes_out,)),
            beta=0.1 * jax.random.normal(k2, (planes_out,)),
            mean=0.1 * jax.random.normal(k3, (planes_out,)),
            var=jax.random.uniform(k4, (planes_out,), minval=0.5, maxval=1.5),
        )

    p = dict(
        w1=0.1 * jax.random.normal(keys[0], (planes_out, planes_in, 3, 3)),
        bn1=bn_params(keys[1]),
        w2=0.1 * jax.random.normal(keys[2], (planes_out, planes_out, 3, 3)),
        bn2=bn_params(keys[3]),
    )
    if downsample:
        p['wsc'] = 0.1 * jax.random.normal(keys[4], (planes_out, planes_in, 1, 1))
        p['bnsc'] = bn_params(keys[5])
    return jax.tree_util.tree_map(lambda a: a.astype(jnp.float32), p)


if __name__ == "__main__":
    key = jax.random.PRNGKey(0)
    kx, kp1, kp2 = jax.random.split(key, 3)

    # x: (2, 4, 16, 16) NCHW, matching the PyTorch module's conv input convention.
    x = jax.random.normal(kx, (2, 4, 16, 16), jnp.float32)

    # ---- Config 1: downsampling block (planes 4 -> 8, stride 2, 1x1-conv shortcut).
    params1 = init_params(kp1, 4, 8, True)
    ref1 = _ref_forward(x, params1, 2, True)

    out1_f32 = jax.block_until_ready(
        rational_basic_block_forward(x, params1, 2, True, matmul_dtype=jnp.float32))
    assert out1_f32.shape == (2, 8, 8, 8)
    assert jnp.allclose(out1_f32, ref1, rtol=5e-3, atol=5e-3), \
        float(jnp.max(jnp.abs(out1_f32 - ref1)))

    out1_bf16 = jax.block_until_ready(
        rational_basic_block_forward(x, params1, 2, True, matmul_dtype=jnp.bfloat16))
    assert out1_bf16.shape == (2, 8, 8, 8)
    out1_bf16 = jnp.asarray(out1_bf16, jnp.float32)
    assert jnp.allclose(out1_bf16, ref1, rtol=5e-2, atol=5e-2), \
        float(jnp.max(jnp.abs(out1_bf16 - ref1)))

    # ---- Config 2: identity-shortcut block (planes 4 -> 4, stride 1).
    params2 = init_params(kp2, 4, 4, False)
    ref2 = _ref_forward(x, params2, 1, False)

    out2_f32 = jax.block_until_ready(
        rational_basic_block_forward(x, params2, 1, False, matmul_dtype=jnp.float32))
    assert out2_f32.shape == (2, 4, 16, 16)
    assert jnp.allclose(out2_f32, ref2, rtol=5e-3, atol=5e-3), \
        float(jnp.max(jnp.abs(out2_f32 - ref2)))

    out2_bf16 = jax.block_until_ready(
        rational_basic_block_forward(x, params2, 1, False, matmul_dtype=jnp.bfloat16))
    assert out2_bf16.shape == (2, 4, 16, 16)
    out2_bf16 = jnp.asarray(out2_bf16, jnp.float32)
    assert jnp.allclose(out2_bf16, ref2, rtol=5e-2, atol=5e-2), \
        float(jnp.max(jnp.abs(out2_bf16 - ref2)))

    print("KERNEL_OK")
</pallas_src>

<mosaic_0001>
module attributes {stable_mosaic.version = 11 : i64} {
  func.func @kernel(%arg0: i32, %arg1: i32, %arg2: memref<1x96x16xf32, #tpu.memory_space<vmem>>, %arg3: memref<4x16x128xf32, #tpu.memory_space<vmem>>, %arg4: memref<1x128xf32, #tpu.memory_space<vmem>>, %arg5: memref<1x80x128xf32, #tpu.memory_space<vmem>>) attributes {dimension_semantics = [#tpu.dimension_semantics<parallel>, #tpu.dimension_semantics<parallel>], iteration_bounds = array<i64: 2, 1>, scalar_prefetch = 0 : i64, scratch_operands = 0 : i64, tpu.core_type = #tpu.core_type<tc>, window_params = [{transform_indices = @transform_0, window_bounds = array<i64: 1, 96, 16>}, {pipeline_mode = #tpu.pipeline_mode<synchronous>, transform_indices = @transform_1, window_bounds = array<i64: 4, 16, 128>}, {pipeline_mode = #tpu.pipeline_mode<synchronous>, transform_indices = @transform_2, window_bounds = array<i64: 1, 128>}, {transform_indices = @transform_3, window_bounds = array<i64: 1, 80, 128>}]} {
    %c80_i32 = arith.constant 80 : i32
    %0 = arith.muli %arg1, %c80_i32 : i32
    %1 = tpu.assume_multiple %0, 16 : i32
    %c0 = arith.constant 0 : index
    %2 = arith.index_cast %1 : i32 to index
    %c0_0 = arith.constant 0 : index
    %3 = vector.load %arg2[%c0, %2, %c0_0] : memref<1x96x16xf32, #tpu.memory_space<vmem>>, vector<1x96x16xf32>
    %4 = vector.shape_cast %3 : vector<1x96x16xf32> to vector<96x16xf32>
    %5 = vector.extract_strided_slice %4 {offsets = [0, 0], sizes = [80, 16], strides = [1, 1]} : vector<96x16xf32> to vector<80x16xf32>
    %c0_1 = arith.constant 0 : index
    %c0_2 = arith.constant 0 : index
    %c0_3 = arith.constant 0 : index
    %6 = vector.load %arg3[%c0_1, %c0_2, %c0_3] : memref<4x16x128xf32, #tpu.memory_space<vmem>>, vector<1x16x128xf32>
    %7 = vector.shape_cast %6 : vector<1x16x128xf32> to vector<16x128xf32>
    %cst = arith.constant dense<0.000000e+00> : vector<80x128xf32>
    %8 = tpu.matmul %5, %7, %cst {dimension_numbers = #tpu.dot_dimension_numbers<[1], [0], [0], [1], [0, 0, 1, 1], [], []>} : vector<80x16xf32>, vector<16x128xf32>, vector<80x128xf32> -> vector<80x128xf32>
    %9 = vector.extract_strided_slice %4 {offsets = [1, 0], sizes = [80, 16], strides = [1, 1]} : vector<96x16xf32> to vector<80x16xf32>
    %c1 = arith.constant 1 : index
    %c0_4 = arith.constant 0 : index
    %c0_5 = arith.constant 0 : index
    %10 = vector.load %arg3[%c1, %c0_4, %c0_5] : memref<4x16x128xf32, #tpu.memory_space<vmem>>, vector<1x16x128xf32>
    %11 = vector.shape_cast %10 : vector<1x16x128xf32> to vector<16x128xf32>
    %cst_6 = arith.constant dense<0.000000e+00> : vector<80x128xf32>
    %12 = tpu.matmul %9, %11, %cst_6 {dimension_numbers = #tpu.dot_dimension_numbers<[1], [0], [0], [1], [0, 0, 1, 1], [], []>} : vector<80x16xf32>, vector<16x128xf32>, vector<80x128xf32> -> vector<80x128xf32>
    %13 = arith.addf %8, %12 : vector<80x128xf32>
    %14 = vector.extract_strided_slice %4 {offsets = [9, 0], sizes = [80, 16], strides = [1, 1]} : vector<96x16xf32> to vector<80x16xf32>
    %c2 = arith.constant 2 : index
    %c0_7 = arith.constant 0 : index
    %c0_8 = arith.constant 0 : index
    %15 = vector.load %arg3[%c2, %c0_7, %c0_8] : memref<4x16x128xf32, #tpu.memory_space<vmem>>, vector<1x16x128xf32>
    %16 = vector.shape_cast %15 : vector<1x16x128xf32> to vector<16x128xf32>
    %cst_9 = arith.constant dense<0.000000e+00> : vector<80x128xf32>
    %17 = tpu.matmul %14, %16, %cst_9 {dimension_numbers = #tpu.dot_dimension_numbers<[1], [0], [0], [1], [0, 0, 1, 1], [], []>} : vector<80x16xf32>, vector<16x128xf32>, vector<80x128xf32> -> vector<80x128xf32>
    %18 = arith.addf %13, %17 : vector<80x128xf32>
    %19 = vector.extract_strided_slice %4 {offsets = [10, 0], sizes = [80, 16], strides = [1, 1]} : vector<96x16xf32> to vector<80x16xf32>
    %c3 = arith.constant 3 : index
    %c0_10 = arith.constant 0 : index
    %c0_11 = arith.constant 0 : index
    %20 = vector.load %arg3[%c3, %c0_10, %c0_11] : memref<4x16x128xf32, #tpu.memory_space<vmem>>, vector<1x16x128xf32>
    %21 = vector.shape_cast %20 : vector<1x16x128xf32> to vector<16x128xf32>
    %cst_12 = arith.constant dense<0.000000e+00> : vector<80x128xf32>
    %22 = tpu.matmul %19, %21, %cst_12 {dimension_numbers = #tpu.dot_dimension_numbers<[1], [0], [0], [1], [0, 0, 1, 1], [], []>} : vector<80x16xf32>, vector<16x128xf32>, vector<80x128xf32> -> vector<80x128xf32>
    %23 = arith.addf %18, %22 : vector<80x128xf32>
    %c0_13 = arith.constant 0 : index
    %c0_14 = arith.constant 0 : index
    %24 = vector.load %arg4[%c0_13, %c0_14] : memref<1x128xf32, #tpu.memory_space<vmem>>, vector<1x128xf32>
    %25 = vector.broadcast %24 : vector<1x128xf32> to vector<80x128xf32>
    %26 = arith.addf %23, %25 : vector<80x128xf32>
    %27 = arith.mulf %26, %26 : vector<80x128xf32>
    %28 = arith.mulf %27, %27 : vector<80x128xf32>
    %cst_15 = arith.constant 0.616901636 : f32
    %29 = vector.broadcast %cst_15 : f32 to vector<80x128xf32>
    %30 = arith.mulf %29, %26 : vector<80x128xf32>
    %cst_16 = arith.constant 0.0299634803 : f32
    %31 = vector.broadcast %cst_16 : f32 to vector<80x128xf32>
    %32 = arith.addf %31, %30 : vector<80x128xf32>
    %cst_17 = arith.constant 3.06608081 : f32
    %33 = vector.broadcast %cst_17 : f32 to vector<80x128xf32>
    %34 = arith.mulf %33, %26 : vector<80x128xf32>
    %cst_18 = arith.constant 2.37539148 : f32
    %35 = vector.broadcast %cst_18 : f32 to vector<80x128xf32>
    %36 = arith.addf %35, %34 : vector<80x128xf32>
    %37 = arith.mulf %27, %36 : vector<80x128xf32>
    %38 = arith.addf %32, %37 : vector<80x128xf32>
    %cst_19 = arith.constant 0.252819866 : f32
    %39 = vector.broadcast %cst_19 : f32 to vector<80x128xf32>
    %40 = arith.mulf %39, %26 : vector<80x128xf32>
    %cst_20 = arith.constant 1.52474451 : f32
    %41 = vector.broadcast %cst_20 : f32 to vector<80x128xf32>
    %42 = arith.addf %41, %40 : vector<80x128xf32>
    %43 = arith.mulf %28, %42 : vector<80x128xf32>
    %44 = arith.addf %38, %43 : vector<80x128xf32>
    %cst_21 = arith.constant 4.40811777 : f32
    %45 = vector.broadcast %cst_21 : f32 to vector<80x128xf32>
    %46 = arith.mulf %45, %26 : vector<80x128xf32>
    %cst_22 = arith.constant 1.19160819 : f32
    %47 = vector.broadcast %cst_22 : f32 to vector<80x128xf32>
    %48 = arith.addf %47, %46 : vector<80x128xf32>
    %49 = arith.mulf %26, %48 : vector<80x128xf32>
    %cst_23 = arith.constant 0.911110341 : f32
    %50 = vector.broadcast %cst_23 : f32 to vector<80x128xf32>
    %51 = arith.mulf %50, %26 : vector<80x128xf32>
    %cst_24 = arith.constant 0.348859817 : f32
    %52 = vector.broadcast %cst_24 : f32 to vector<80x128xf32>
    %53 = arith.mulf %52, %27 : vector<80x128xf32>
    %54 = arith.addf %51, %53 : vector<80x128xf32>
    %55 = arith.mulf %27, %54 : vector<80x128xf32>
    %56 = arith.addf %49, %55 : vector<80x128xf32>
    %57 = math.absf %56 : vector<80x128xf32>
    %cst_25 = arith.constant 1.000000e+00 : f32
    %58 = vector.broadcast %cst_25 : f32 to vector<80x128xf32>
    %59 = arith.addf %58, %57 : vector<80x128xf32>
    %60 = tpu.reciprocal %59 {approx = true} : vector<80x128xf32> -> vector<80x128xf32>
    %61 = arith.mulf %44, %60 : vector<80x128xf32>
    %c0_26 = arith.constant 0 : index
    %c0_27 = arith.constant 0 : index
    %c0_28 = arith.constant 0 : index
    %62 = vector.load %arg5[%c0_26, %c0_27, %c0_28] : memref<1x80x128xf32, #tpu.memory_space<vmem>>, vector<1x80x128xf32>
    %63 = vector.shape_cast %62 : vector<1x80x128xf32> to vector<80x128xf32>
    %64 = vector.shape_cast %61 : vector<80x128xf32> to vector<1x80x128xf32>
    tpu.vector_store %arg5[%c0_26, %c0_27, %c0_28], %64 {strides = array<i32>} : memref<1x80x128xf32, #tpu.memory_space<vmem>>, vector<1x80x128xf32>,
    return
  }
  func.func @transform_0(%arg0: i32, %arg1: i32) -> (i32, i32, i32) {
    %c0_i32 = arith.constant 0 : i32
    %c0_i32_0 = arith.constant 0 : i32
    %c0_i32_1 = arith.constant 0 : i32
    return %arg0, %c0_i32, %c0_i32_0 : i32, i32, i32
  }
  func.func @transform_1(%arg0: i32, %arg1: i32) -> (i32, i32, i32) {
    %c0_i32 = arith.constant 0 : i32
    %c0_i32_0 = arith.constant 0 : i32
    %c0_i32_1 = arith.constant 0 : i32
    %c0_i32_2 = arith.constant 0 : i32
    return %c0_i32, %c0_i32_0, %c0_i32_1 : i32, i32, i32
  }
  func.func @transform_2(%arg0: i32, %arg1: i32) -> (i32, i32) {
    %c0_i32 = arith.constant 0 : i32
    %c0_i32_0 = arith.constant 0 : i32
    %c0_i32_1 = arith.constant 0 : i32
    return %c0_i32, %c0_i32_0 : i32, i32
  }
  func.func @transform_3(%arg0: i32, %arg1: i32) -> (i32, i32, i32) {
    %c0_i32 = arith.constant 0 : i32
    %c0_i32_0 = arith.constant 0 : i32
    return %arg0, %arg1, %c0_i32 : i32, i32, i32
  }
}

</mosaic_0001>

<bundles_post_ra>
// kernel: tpu_custom_call.1
= control target key start
LH: loop header
LB: loop body
LE: loop exit
PB: predicated region body
PF: predicated region fallthrough
CT: control target
= control target key end

     0   :  { %8 = vsyncpa [#allocation3], 0  ;;  %s1364_s0 = inlined_call_operand.vmem [shape: f32[2,96,16], index: 0, kind: input, shape index: {}]   ;;  %s1365_s1 = inlined_call_operand.vmem [shape: f32[4,16,128], index: 1, kind: input, shape index: {}]   ;;  %s1366_s2 = inlined_call_operand.vmem [shape: f32[1,128], index: 2, kind: input, shape index: {}]   ;;  %s1367_s3 = inlined_call_operand.hbm [shape: f32[2,80,128], index: 3, kind: output, shape index: {}]  }
   0x1   :  { %10 = vsyncpa [#allocation3 + $0x1], 0  ;;  %s1133_s12 = smov 0   ;;  %s1135_s13 = smov 0  }
   0x2   :  { %s1137_s14 = smov 0   ;;  %s1139_s15 = smov 0  }
   0x3   :  { %s1141_s16 = smov 0   ;;  %s1143_s17 = smov 0  }
   0x4 LB: > { %s895_s18 = sadd.s32 4294967295, %s1109_s17   ;;  %s896_s19 = sadd.s32 4294967294, %s1109_s17   ;;  %s1109_s17 = sphi %s1143_s17, %s16_s17   ;;  %s1105_s16 = sphi %s1141_s16, %s1374_s16   ;;  %s1101_s15 = sphi %s1139_s15, %s1373_s15   ;;  %s1097_s14 = sphi %s1137_s14, %s1372_s14   ;;  %s1093_s13 = sphi %s1135_s13, %s1371_s13   ;;  %s1089_s12 = sphi %s1133_s12, %s1370_s12  }
   0x5   : > { %s28_s20 = sadd.s32 1, %s1105_s16  ;;  %s105_s21 = sadd.s32 1, %s1097_s14 }
   0x6   : > { %p30_p0 = scmp.ge.s32.totalorder %s28_s20, 2  ;;  %p115_p1 = scmp.ne.s32.totalorder %s1097_s14, %s1093_s13 }
   0x7   : > { %p116_p2 = scmp.eq.s32.totalorder %s895_s18, 1  ;;  %p121_p3 = scmp.ne.s32.totalorder %s1093_s13, %s1089_s12 }
   0x8   : > { %s1376_s20 = smov (%p30_p0, %s28_s20), 0  ;;  %p122_p5 = scmp.eq.s32.totalorder %s896_s19, 1 }
   0x9   : > { %p1173_p4 = por %p116_p2, %p115_p1  ;;  %s100_s23 = ssub.s32 %s1105_s16, %s1376_s20 }
   0xa   : > { %p899_p6 = scmp.ge.s32.totalorder %s1109_s17, 1  ;;  %p103_p7 = scmp.eq.s32.totalorder %s100_s23, 0 }
   0xb   : > { %p1180_p8 = por %p122_p5, %p121_p3  ;;  %p154_p9 = scmp.lt.s32.totalorder %s1109_s17, 3 }
   0xc   : > { %s1186_s25 = scalar_select %p103_p7, %s1097_s14, %s105_s21  }
   0xd   : > { %p155_p10 = pnand %p899_p6, %p154_p9 }
   0xe   : > { %p178_p11 = scmp.lt.s32.totalorder (!%p155_p10), %s1101_s15, 1  ;;  %s175_s5 = sand.u32 (!%p155_p10), 1, %s1093_s13  }
   0xf   : > { %158 = sbr.rel (%p155_p10) target bundleno = 266 (0x10a), region = 32  ;;  %s803_s19 = scalar_lea.sflag (!%p155_p10), [#allocation3], %s175_s5 }
  0x10   : > { %s1303_s6 = smul.u32 (!%p155_p10), 80, %s175_s5  ;;  %s1051_s28 = scalar_lea.hbm (!%p155_p10), %s1367_s3, 160 }
  0x11   : > { %s952_s8 = smul.u32 (!%p155_p10), 80, %s1101_s15 }
  0x12   : > { %s1307_s7 = scalar_lea.vmem (!%p155_p10), [#allocation2], %s1303_s6 }
  0x14   : > { %v924_v0 = vld [vmem:[%s1365_s1 + $0x28] sm:$0xff]  ;;  %v923_v1 = vld [vmem:[%s1365_s1 + $0x20] sm:$0xff]  ;;  %v936_v2 = vld [vmem:[%s1365_s1 + $0x38] sm:$0xff]  ;;  %s179_s11 = scalar_select %p178_p11, %s1101_s15, 1  ;;  %vm214_vm0 = vcmask 1046528   ;;  %vm236_vm1 = vcmask 130048  }
  0x15   : > { %393 = vmatpush.msra.mxu2 %v924_v0  ;;  %495 = vmatpush.msra.mxu3 %v936_v2  ;;  %v902_v3 = vld [vmem:[%s1365_s1 + $0x18] sm:$0xff]  ;;  %v199_v4 = vld [vmem:[%s1365_s1 + $0x8] sm:$0xff]  ;;  %v935_v5 = vld [vmem:[%s1365_s1 + $0x30] sm:$0xff]  ;;  %vm439_vm2 = vcmask 1045504   ;;  %s817_s15 = sshll.u32 %s1307_s7, 4  ;;  %s818_s15 = int_to_ptr.vmem [resolvable:$true] %s817_s15 }
  0x16   : > { %271 = vmatpush.msra.mxu0 %v902_v3  ;;  %338 = vmatpush.msra.mxu1 %v199_v4  ;;  %v901_v6 = vld [vmem:[%s1365_s1 + $0x10] sm:$0xff]  ;;  %v198_v7 = vld [vmem:[%s1365_s1] sm:$0xff]  ;;  %s951_s26 = smul.u32 96, %s179_s11  ;;  %s816_s11 = scalar_lea.hbm %s1367_s3, %s952_s8 }
  0x17   : > { %394 = vmatpush.msra.mxu2 %v923_v1  ;;  %496 = vmatpush.msra.mxu3 %v935_v5  ;;  %s819_s18 = sshll.u32 %s816_s11, 4  ;;  %s820_s18 = int_to_ptr.hbm [resolvable:$true] %s819_s18 }
  0x18   : > { %272 = vmatpush.msra.mxu0 %v901_v6  ;;  %339 = vmatpush.msra.mxu1 %v198_v7  ;;  %s1217_s29 = scalar_lea.vmem %s1364_s0, %s951_s26  ;;  %v1295_v7 = vld [vmem:[%s1366_s2] ss:$0 sm:$0xff]  ;;  %s1045_s21 = sshra.s32 %s820_s18, 4  ;;  %s1046_s21 = int_to_ptr.hbm [resolvable:$true] %s1045_s21 }
  0x19   : > { %v187_v8 = vld [vmem:[%s1217_s29 + $0x8] sm:$0xff]  ;;  %v188_v9 = vld [vmem:[%s1217_s29 + $0x10] sm:$0xff]  ;;  %v186_v10 = vld [vmem:[%s1217_s29] sm:$0xff]  ;;  %s1047_s23 = scalar_lea.hbm %s1046_s21, 80  ;;  %p1052_p1 = scmp.lt.s32.totalorder %s1046_s21, %s1367_s3 }
  0x1a   : > { %v216_v11 = vrot.slane %v187_v8, 1  ;;  %v218_v12 = vrot.slane %v188_v9, 1  ;;  %v440_v13 = vrot.slane %v187_v8, 2  ;;  %v441_v14 = vrot.slane %v188_v9, 2  ;;  %913 = vmatmul.msk.f32.vlgmr.msra.gmra.mxu1 %vm236_vm1, %v186_v10  ;;  %v189_v16 = vld [vmem:[%s1217_s29 + $0x18] sm:$0xff]  ;;  %v190_v24 = vld [vmem:[%s1217_s29 + $0x20] sm:$0xff]  ;;  %p1048_p12 = scmp.ne.s32.totalorder %s1046_s21, %s1047_s23  ;;  %p1053_p2 = scmp.lt.s32.totalorder %s1051_s28, %s1047_s23 }
  0x1b   : > { %v215_v15 = vrot.slane %v186_v10, 1  ;;  %v220_v20 = vrot.slane %v189_v16, 1  ;;  %v443_v21 = vrot.slane %v189_v16, 2  ;;  %v222_v25 = vrot.slane %v190_v24, 1  ;;  %v191_v29 = vld [vmem:[%s1217_s29 + $0x28] sm:$0xff]  ;;  %v192_v34 = vld [vmem:[%s1217_s29 + $0x30] sm:$0xff] }
  0x1c   : > { %v219_v17 = vsel %vm214_vm0, %v216_v11, %v218_v12  ;;  %v442_v18 = vsel %vm439_vm2, %v440_v13, %v441_v14  ;;  %v445_v26 = vrot.slane %v190_v24, 2  ;;  %v224_v30 = vrot.slane %v191_v29, 1  ;;  %v195_v35 = vld [vmem:[%s1217_s29 + $0x48] sm:$0xff]  ;;  %v196_v38 = vld [vmem:[%s1217_s29 + $0x50] sm:$0xff]  ;;  %v193_v44 = vld [vmem:[%s1217_s29 + $0x38] sm:$0xff]  ;;  %p1049_p13 = pnand %p1048_p12, %p1173_p4  ;;  %p1054_p3 = por %p1053_p2, %p1052_p1 }
  0x1d   : > { %925 = vmatmul.msk.f32.vlgmr.msra.gmra.mxu2 %vm236_vm1, %v219_v17  ;;  %937 = vmatmul.msk.f32.vlgmr.msra.gmra.mxu3 %vm236_vm1, %v442_v18  ;;  %v217_v19 = vsel %vm214_vm0, %v215_v15, %v216_v11  ;;  %v221_v22 = vsel %vm214_vm0, %v218_v12, %v220_v20  ;;  %v444_v23 = vsel %vm439_vm2, %v441_v14, %v443_v21  ;;  %v447_v31 = vrot.slane %v191_v29, 2  ;;  %v197_v50 = vld [vmem:[%s1217_s29 + $0x58] sm:$0xff]  ;;  %v194_v55 = vld [vmem:[%s1217_s29 + $0x40] sm:$0xff] }
  0x1e   : > { %903 = vmatmul.msk.f32.vlgmr.msra.gmra.mxu0 %vm236_vm1, %v217_v19  ;;  %v223_v27 = vsel %vm214_vm0, %v220_v20, %v222_v25  ;;  %v446_v28 = vsel %vm439_vm2, %v443_v21, %v445_v26  ;;  %v225_v32 = vsel %vm214_vm0, %v222_v25, %v224_v30  ;;  %v226_v36 = vrot.slane %v192_v34, 1  ;;  %p1050_p0 = pneg %p1049_p13 }
  0x1f   : > { %v448_v33 = vsel %vm439_vm2, %v445_v26, %v447_v31  ;;  %v449_v37 = vrot.slane %v192_v34, 2  ;;  %v232_v39 = vrot.slane %v195_v35, 1  ;;  %v234_v40 = vrot.slane %v196_v38, 1 }
  0x20   : > { %v227_v42 = vsel %vm214_vm0, %v224_v30, %v226_v36  ;;  %v455_v45 = vrot.slane %v195_v35, 2  ;;  %v457_v46 = vrot.slane %v196_v38, 2  ;;  %v228_v47 = vrot.slane %v193_v44, 1  ;;  %p1055_p5 = pnand %p1054_p3, %p1050_p0 }
  0x21   : > { %v235_v41 = vsel %vm214_vm0, %v232_v39, %v234_v40  ;;  %v450_v43 = vsel %vm439_vm2, %v447_v31, %v449_v37  ;;  %v451_v48 = vrot.slane %v193_v44, 2  ;;  %v375_v51 = vrot.slane %v197_v50, 1 }
  0x22   : > { %914 = vmatmul.msk.f32.gmra.mxu1 %vm236_vm1, %v187_v8  ;;  %v458_v49 = vsel %vm439_vm2, %v455_v45, %v457_v46  ;;  %v229_v53 = vsel %vm214_vm0, %v226_v36, %v228_v47  ;;  %v459_v56 = vrot.slane %v197_v50, 2  ;;  %v230_v57 = vrot.slane %v194_v55, 1 }
  0x23   : > { %v376_v52 = vsel %vm214_vm0, %v234_v40, %v375_v51  ;;  %v452_v54 = vsel %vm439_vm2, %v449_v37, %v451_v48  ;;  %v453_v58 = vrot.slane %v194_v55, 2 }
  0x24   : > { %v460_v59 = vsel %vm439_vm2, %v457_v46, %v459_v56  ;;  %v231_v60 = vsel %vm214_vm0, %v228_v47, %v230_v57  ;;  %v233_v62 = vsel %vm214_vm0, %v230_v57, %v232_v39 }
  0x25   : > { %926 = vmatmul.msk.f32.gmra.mxu2 %vm236_vm1, %v221_v22  ;;  %938 = vmatmul.msk.f32.gmra.mxu3 %vm236_vm1, %v444_v23  ;;  %v454_v61 = vsel %vm439_vm2, %v451_v48, %v453_v58  ;;  %v456_v63 = vsel %vm439_vm2, %v453_v58, %v455_v45 }
  0x26   : > { %904 = vmatmul.msk.f32.gmra.mxu0 %vm236_vm1, %v219_v17 }
  0x2a   : > { %915 = vmatmul.msk.f32.gmra.mxu1 %vm236_vm1, %v188_v9 }
  0x2d   : > { %927 = vmatmul.msk.f32.gmra.mxu2 %vm236_vm1, %v223_v27  ;;  %939 = vmatmul.msk.f32.gmra.mxu3 %vm236_vm1, %v446_v28 }
  0x2e   : > { %905 = vmatmul.msk.f32.gmra.mxu0 %vm236_vm1, %v221_v22 }
  0x32   : > { %916 = vmatmul.msk.f32.gmra.mxu1 %vm236_vm1, %v189_v16 }
  0x35   : > { %928 = vmatmul.msk.f32.gmra.mxu2 %vm236_vm1, %v225_v32  ;;  %940 = vmatmul.msk.f32.gmra.mxu3 %vm236_vm1, %v448_v33 }
  0x36   : > { %906 = vmatmul.msk.f32.gmra.mxu0 %vm236_vm1, %v223_v27 }
  0x3a   : > { %917 = vmatmul.msk.f32.gmra.mxu1 %vm236_vm1, %v190_v24 }
  0x3d   : > { %929 = vmatmul.msk.f32.gmra.mxu2 %vm236_vm1, %v227_v42  ;;  %941 = vmatmul.msk.f32.gmra.mxu3 %vm236_vm1, %v450_v43 }
  0x3e   : > { %907 = vmatmul.msk.f32.gmra.mxu0 %vm236_vm1, %v225_v32 }
  0x42   : > { %918 = vmatmul.msk.f32.gmra.mxu1 %vm236_vm1, %v191_v29 }
  0x45   : > { %930 = vmatmul.msk.f32.gmra.mxu2 %vm236_vm1, %v229_v53  ;;  %942 = vmatmul.msk.f32.gmra.mxu3 %vm236_vm1, %v452_v54 }
  0x46   : > { %908 = vmatmul.msk.f32.gmra.mxu0 %vm236_vm1, %v227_v42 }
  0x4a   : > { %919 = vmatmul.msk.f32.gmra.mxu1 %vm236_vm1, %v192_v34 }
  0x4d   : > { %931 = vmatmul.msk.f32.gmra.mxu2 %vm236_vm1, %v231_v60  ;;  %943 = vmatmul.msk.f32.gmra.mxu3 %vm236_vm1, %v454_v61 }
  0x4e   : > { %909 = vmatmul.msk.f32.gmra.mxu0 %vm236_vm1, %v229_v53 }
  0x52   : > { %920 = vmatmul.msk.f32.gmra.mxu1 %vm236_vm1, %v193_v44 }
  0x55   : > { %932 = vmatmul.msk.f32.gmra.mxu2 %vm236_vm1, %v233_v62  ;;  %944 = vmatmul.msk.f32.gmra.mxu3 %vm236_vm1, %v456_v63 }
  0x56   : > { %910 = vmatmul.msk.f32.gmra.mxu0 %vm236_vm1, %v231_v60 }
  0x5a   : > { %921 = vmatmul.msk.f32.gmra.mxu1 %vm236_vm1, %v194_v55 }
  0x5d   : > { %933 = vmatmul.msk.f32.gmra.mxu2 %vm236_vm1, %v235_v41  ;;  %945 = vmatmul.msk.f32.gmra.mxu3 %vm236_vm1, %v458_v49 }
  0x5e   : > { %911 = vmatmul.msk.f32.gmra.mxu0 %vm236_vm1, %v233_v62 }
  0x62   : > { %922 = vmatmul.msk.f32.gmra.mxu1 %vm236_vm1, %v195_v35 }
  0x65   : > { %934 = vmatmul.msk.f32.gmra.mxu2 %vm236_vm1, %v376_v52  ;;  %946 = vmatmul.msk.f32.gmra.mxu3 %vm236_vm1, %v460_v59 }
  0x66   : > { %912 = vmatmul.msk.f32.gmra.mxu0 %vm236_vm1, %v235_v41 }
  0x97   : > { %v341_v0 = vpop.f32.mrf.mxu1 }
  0x9b   : > { %v274_v1 = vpop.f32.mrf.mxu0 }
  0x9c   : > { %v342_v2 = vadd.f32 %v341_v0, %v274_v1 }
  0x9f   : > { %v344_v3 = vpop.f32.mrf.mxu1 }
  0xa0   : > { %v396_v4 = vpop.f32.mrf.mxu2  ;;  %v498_v5 = vpop.f32.mrf.mxu3 }
  0xa1   : > { %v426_v6 = vadd.f32 %v396_v4, %v342_v2 }
  0xa3   : > { %v528_v8 = vadd.f32 %v498_v5, %v426_v6  ;;  %v277_v9 = vpop.f32.mrf.mxu0 }
  0xa4   : > { %v345_v11 = vadd.f32 %v344_v3, %v277_v9 }
  0xa5   : > { %v542_v10 = vadd.f32 %v1295_v7, %v528_v8 }
  0xa7   : > { %v552_v12 = vmul.f32 %v542_v10, %v542_v10  ;;  %v347_v13 = vpop.f32.mrf.mxu1  ;;  %v672_v14 = vmul.f32 4.408118, %v542_v10  ;;  %v592_v17 = vmul.f32 3.0660808, %v542_v10  ;;  %v702_v19 = vmul.f32 0.91111034, %v542_v10 }
  0xa8   : > { %v399_v15 = vpop.f32.mrf.mxu2  ;;  %v501_v16 = vpop.f32.mrf.mxu3  ;;  %v572_v35 = vmul.f32 0.61690164, %v542_v10  ;;  %v632_v36 = vmul.f32 0.25281987, %v542_v10 }
  0xa9   : > { %v682_v18 = vadd.f32 1.1916082, %v672_v14  ;;  %v712_v20 = vmul.f32 0.34885982, %v552_v12  ;;  %v427_v21 = vadd.f32 %v399_v15, %v345_v11  ;;  %v602_v26 = vadd.f32 2.3753915, %v592_v17 }
  0xaa   : > { %v562_v46 = vmul.f32 %v552_v12, %v552_v12  ;;  %v582_v49 = vadd.f32 0.02996348, %v572_v35  ;;  %v642_v50 = vadd.f32 1.5247445, %v632_v36 }
  0xab   : > { %v280_v22 = vpop.f32.mrf.mxu0  ;;  %v722_v23 = vadd.f32 %v712_v20, %v702_v19  ;;  %v529_v24 = vadd.f32 %v501_v16, %v427_v21  ;;  %v692_v27 = vmul.f32 %v682_v18, %v542_v10  ;;  %v612_v39 = vmul.f32 %v602_v26, %v552_v12 }
  0xac   : > { %v348_v25 = vadd.f32 %v347_v13, %v280_v22  ;;  %v652_v0 = vmul.f32 %v642_v50, %v562_v46 }
  0xad   : > { %v732_v28 = vmul.f32 %v722_v23, %v552_v12  ;;  %v543_v29 = vadd.f32 %v1295_v7, %v529_v24  ;;  %v622_v54 = vadd.f32 %v612_v39, %v582_v49 }
  0xaf   : > { %v350_v30 = vpop.f32.mrf.mxu1  ;;  %v742_v31 = vadd.f32 %v732_v28, %v692_v27  ;;  %v553_v32 = vmul.f32 %v543_v29, %v543_v29  ;;  %v673_v37 = vmul.f32 4.408118, %v543_v29  ;;  %v703_v42 = vmul.f32 0.91111034, %v543_v29 }
  0xb0   : > { %v402_v33 = vpop.f32.mrf.mxu2  ;;  %v504_v34 = vpop.f32.mrf.mxu3  ;;  %v593_v48 = vmul.f32 3.0660808, %v543_v29  ;;  %v573_v59 = vmul.f32 0.61690164, %v543_v29  ;;  %v633_v1 = vmul.f32 0.25281987, %v543_v29  ;;  %v662_v9 = vadd.f32 %v652_v0, %v622_v54 }
  0xb1   : > { %v428_v38 = vadd.f32 %v402_v33, %v348_v25  ;;  %v752_v40 = vand.u32 2147483647, %v742_v31  ;;  %v683_v41 = vadd.f32 1.1916082, %v673_v37  ;;  %v713_v43 = vmul.f32 0.34885982, %v553_v32 }
  0xb2   : > { %v603_v60 = vadd.f32 2.3753915, %v593_v48  ;;  %v563_v10 = vmul.f32 %v553_v32, %v553_v32  ;;  %v583_v14 = vadd.f32 0.02996348, %v573_v59  ;;  %v643_v19 = vadd.f32 1.5247445, %v633_v1 }
  0xb3   : > { %v530_v44 = vadd.f32 %v504_v34, %v428_v38  ;;  %v283_v45 = vpop.f32.mrf.mxu0  ;;  %v762_v47 = vadd.f32 1.0, %v752_v40  ;;  %v723_v51 = vadd.f32 %v713_v43, %v703_v42  ;;  %v693_v55 = vmul.f32 %v683_v41, %v543_v29 }
  0xb4   : > { %v351_v53 = vadd.f32 %v350_v30, %v283_v45  ;;  %v613_v15 = vmul.f32 %v603_v60, %v553_v32  ;;  %v653_v36 = vmul.f32 %v643_v19, %v563_v10 }
  0xb5   : > { %v544_v52 = vadd.f32 %v1295_v7, %v530_v44  ;;  %1011 = vrcp.f32 %v762_v47  ;;  %v733_v56 = vmul.f32 %v723_v51, %v553_v32 }
  0xb6   : > { %v623_v27 = vadd.f32 %v613_v15, %v583_v14 }
  0xb7   : > { %v554_v57 = vmul.f32 %v544_v52, %v544_v52  ;;  %v353_v58 = vpop.f32.mrf.mxu1  ;;  %v674_v61 = vmul.f32 4.408118, %v544_v52  ;;  %v743_v2 = vadd.f32 %v733_v56, %v693_v55  ;;  %v594_v3 = vmul.f32 3.0660808, %v544_v52 }
  0xb8   : > { %v405_v62 = vpop.f32.mrf.mxu2  ;;  %v507_v63 = vpop.f32.mrf.mxu3  ;;  %v704_v5 = vmul.f32 0.91111034, %v544_v52  ;;  %v574_v32 = vmul.f32 0.61690164, %v544_v52  ;;  %v634_v33 = vmul.f32 0.25281987, %v544_v52  ;;  %v663_v44 = vadd.f32 %v653_v36, %v623_v27 }
  0xb9   : > { %v684_v4 = vadd.f32 1.1916082, %v674_v61  ;;  %v714_v6 = vmul.f32 0.34885982, %v554_v57  ;;  %v429_v8 = vadd.f32 %v405_v62, %v351_v53  ;;  %v753_v11 = vand.u32 2147483647, %v743_v2 }
  0xba   : > { %v604_v22 = vadd.f32 2.3753915, %v594_v3  ;;  %v564_v45 = vmul.f32 %v554_v57, %v554_v57  ;;  %v584_v49 = vadd.f32 0.02996348, %v574_v32  ;;  %v644_v50 = vadd.f32 1.5247445, %v634_v33 }
  0xbb   : > { %v286_v12 = vpop.f32.mrf.mxu0  ;;  %v1012_v13 = vpop.eup %1011  ;;  %v724_v16 = vadd.f32 %v714_v6, %v704_v5  ;;  %v531_v17 = vadd.f32 %v507_v63, %v429_v8  ;;  %v763_v20 = vadd.f32 1.0, %v753_v11  ;;  %v694_v23 = vmul.f32 %v684_v4, %v544_v52 }
  0xbc   : > { %v782_v18 = vmul.f32 %v1012_v13, %v662_v9  ;;  %v354_v21 = vadd.f32 %v353_v58, %v286_v12  ;;  %v614_v37 = vmul.f32 %v604_v22, %v554_v57  ;;  %v654_v0 = vmul.f32 %v644_v50, %v564_v45 }
  0xbd   : > { %v734_v24 = vmul.f32 %v724_v16, %v554_v57  ;;  %v545_v25 = vadd.f32 %v1295_v7, %v531_v17  ;;  %1013 = vrcp.f32 %v763_v20 }
  0xbe   : > { %792 = vst [vmem:[%s1307_s7] sm:$0xff] %v782_v18  ;;  %v624_v55 = vadd.f32 %v614_v37, %v584_v49 }
  0xbf   : > { %v356_v26 = vpop.f32.mrf.mxu1  ;;  %v744_v28 = vadd.f32 %v734_v24, %v694_v23  ;;  %v555_v29 = vmul.f32 %v545_v25, %v545_v25  ;;  %v675_v34 = vmul.f32 4.408118, %v545_v25  ;;  %v705_v40 = vmul.f32 0.91111034, %v545_v25 }
  0xc0   : > { %v408_v30 = vpop.f32.mrf.mxu2  ;;  %v510_v31 = vpop.f32.mrf.mxu3  ;;  %v595_v47 = vmul.f32 3.0660808, %v545_v25  ;;  %v575_v2 = vmul.f32 0.61690164, %v545_v25  ;;  %v635_v3 = vmul.f32 0.25281987, %v545_v25  ;;  %v664_v6 = vadd.f32 %v654_v0, %v624_v55 }
  0xc1   : > { %v430_v35 = vadd.f32 %v408_v30, %v354_v21  ;;  %v754_v38 = vand.u32 2147483647, %v744_v28  ;;  %v685_v39 = vadd.f32 1.1916082, %v675_v34  ;;  %v715_v41 = vmul.f32 0.34885982, %v555_v29 }
  0xc2   : > { %v605_v61 = vadd.f32 2.3753915, %v595_v47  ;;  %v565_v20 = vmul.f32 %v555_v29, %v555_v29  ;;  %v585_v21 = vadd.f32 0.02996348, %v575_v2  ;;  %v645_v22 = vadd.f32 1.5247445, %v635_v3 }
  0xc3   : > { %v532_v42 = vadd.f32 %v510_v31, %v430_v35  ;;  %v289_v43 = vpop.f32.mrf.mxu0  ;;  %v764_v46 = vadd.f32 1.0, %v754_v38  ;;  %v1014_v48 = vpop.eup %1013  ;;  %v725_v51 = vadd.f32 %v715_v41, %v705_v40  ;;  %v695_v56 = vmul.f32 %v685_v39, %v545_v25 }
  0xc4   : > { %v783_v53 = vmul.f32 %v1014_v48, %v663_v44  ;;  %v357_v54 = vadd.f32 %v356_v26, %v289_v43  ;;  %v615_v13 = vmul.f32 %v605_v61, %v555_v29  ;;  %v655_v37 = vmul.f32 %v645_v22, %v565_v20 }
  0xc5   : > { %v546_v52 = vadd.f32 %v1295_v7, %v532_v42  ;;  %1015 = vrcp.f32 %v764_v46  ;;  %v735_v58 = vmul.f32 %v725_v51, %v555_v29 }
  0xc6   : > { %793 = vst [vmem:[%s1307_s7 + $0x8] sm:$0xff] %v783_v53  ;;  %v625_v27 = vadd.f32 %v615_v13, %v585_v21 }
  0xc7   : > { %v556_v59 = vmul.f32 %v546_v52, %v546_v52  ;;  %v359_v60 = vpop.f32.mrf.mxu1  ;;  %v676_v57 = vmul.f32 4.408118, %v546_v52  ;;  %v745_v1 = vadd.f32 %v735_v58, %v695_v56  ;;  %v706_v9 = vmul.f32 0.91111034, %v546_v52 }
  0xc8   : > { %v411_v62 = vpop.f32.mrf.mxu2  ;;  %v513_v63 = vpop.f32.mrf.mxu3  ;;  %v596_v14 = vmul.f32 3.0660808, %v546_v52  ;;  %v636_v33 = vmul.f32 0.25281987, %v546_v52  ;;  %v576_v29 = vmul.f32 0.61690164, %v546_v52  ;;  %v665_v44 = vadd.f32 %v655_v37, %v625_v27 }
  0xc9   : > { %v686_v4 = vadd.f32 1.1916082, %v676_v57  ;;  %v431_v5 = vadd.f32 %v411_v62, %v357_v54  ;;  %v755_v8 = vand.u32 2147483647, %v745_v1  ;;  %v716_v10 = vmul.f32 0.34885982, %v556_v59 }
  0xca   : > { %v606_v28 = vadd.f32 2.3753915, %v596_v14  ;;  %v566_v45 = vmul.f32 %v556_v59, %v556_v59  ;;  %v646_v49 = vadd.f32 1.5247445, %v636_v33  ;;  %v586_v55 = vadd.f32 0.02996348, %v576_v29 }
  0xcb   : > { %v292_v11 = vpop.f32.mrf.mxu0  ;;  %v1016_v12 = vpop.eup %1015  ;;  %v533_v15 = vadd.f32 %v513_v63, %v431_v5  ;;  %v765_v17 = vadd.f32 1.0, %v755_v8  ;;  %v726_v18 = vadd.f32 %v716_v10, %v706_v9  ;;  %v696_v24 = vmul.f32 %v686_v4, %v546_v52 }
  0xcc   : > { %v784_v16 = vmul.f32 %v1016_v12, %v664_v6  ;;  %v360_v19 = vadd.f32 %v359_v60, %v292_v11  ;;  %v616_v46 = vmul.f32 %v606_v28, %v556_v59 }
  0xcd   : > { %v547_v23 = vadd.f32 %v1295_v7, %v533_v15  ;;  %1017 = vrcp.f32 %v765_v17  ;;  %v736_v25 = vmul.f32 %v726_v18, %v556_v59  ;;  %v656_v59 = vmul.f32 %v646_v49, %v566_v45 }
  0xce   : > { %794 = vst [vmem:[%s1307_s7 + $0x10] sm:$0xff] %v784_v16  ;;  %v626_v61 = vadd.f32 %v616_v46, %v586_v55 }
  0xcf   : > { %v362_v26 = vpop.f32.mrf.mxu1  ;;  %v557_v30 = vmul.f32 %v547_v23, %v547_v23  ;;  %v746_v34 = vadd.f32 %v736_v25, %v696_v24  ;;  %v677_v35 = vmul.f32 4.408118, %v547_v23  ;;  %v707_v38 = vmul.f32 0.91111034, %v547_v23 }
  0xd0   : > { %v414_v31 = vpop.f32.mrf.mxu2  ;;  %v516_v32 = vpop.f32.mrf.mxu3  ;;  %v597_v47 = vmul.f32 3.0660808, %v547_v23  ;;  %v577_v0 = vmul.f32 0.61690164, %v547_v23  ;;  %v637_v4 = vmul.f32 0.25281987, %v547_v23  ;;  %v666_v13 = vadd.f32 %v656_v59, %v626_v61 }
  0xd1   : > { %v432_v36 = vadd.f32 %v414_v31, %v360_v19  ;;  %v756_v39 = vand.u32 2147483647, %v746_v34  ;;  %v687_v40 = vadd.f32 1.1916082, %v677_v35  ;;  %v717_v41 = vmul.f32 0.34885982, %v557_v30 }
  0xd2   : > { %v607_v57 = vadd.f32 2.3753915, %v597_v47  ;;  %v567_v17 = vmul.f32 %v557_v30, %v557_v30  ;;  %v587_v18 = vadd.f32 0.02996348, %v577_v0  ;;  %v647_v22 = vadd.f32 1.5247445, %v637_v4 }
  0xd3   : > { %v534_v42 = vadd.f32 %v516_v32, %v432_v36  ;;  %v295_v43 = vpop.f32.mrf.mxu0  ;;  %v1018_v48 = vpop.eup %1017  ;;  %v766_v50 = vadd.f32 1.0, %v756_v39  ;;  %v727_v51 = vadd.f32 %v717_v41, %v707_v38  ;;  %v697_v56 = vmul.f32 %v687_v40, %v547_v23 }
  0xd4   : > { %v785_v54 = vmul.f32 %v1018_v48, %v665_v44  ;;  %v363_v52 = vadd.f32 %v362_v26, %v295_v43  ;;  %v617_v14 = vmul.f32 %v607_v57, %v557_v30  ;;  %v657_v37 = vmul.f32 %v647_v22, %v567_v17 }
  0xd5   : > { %v548_v53 = vadd.f32 %v1295_v7, %v534_v42  ;;  %1019 = vrcp.f32 %v766_v50  ;;  %v737_v58 = vmul.f32 %v727_v51, %v557_v30 }
  0xd6   : > { %795 = vst [vmem:[%s1307_s7 + $0x18] sm:$0xff] %v785_v54  ;;  %v627_v28 = vadd.f32 %v617_v14, %v587_v18 }
  0xd7   : > { %v558_v60 = vmul.f32 %v548_v53, %v548_v53  ;;  %v747_v1 = vadd.f32 %v737_v58, %v697_v56  ;;  %v678_v2 = vmul.f32 4.408118, %v548_v53  ;;  %v365_v3 = vpop.f32.mrf.mxu1  ;;  %v598_v5 = vmul.f32 3.0660808, %v548_v53 }
  0xd8   : > { %v417_v62 = vpop.f32.mrf.mxu2  ;;  %v519_v63 = vpop.f32.mrf.mxu3  ;;  %v708_v6 = vmul.f32 0.91111034, %v548_v53  ;;  %v578_v34 = vmul.f32 0.61690164, %v548_v53  ;;  %v638_v35 = vmul.f32 0.25281987, %v548_v53  ;;  %v667_v46 = vadd.f32 %v657_v37, %v627_v28 }
  0xd9   : > { %v433_v8 = vadd.f32 %v417_v62, %v363_v52  ;;  %v757_v9 = vand.u32 2147483647, %v747_v1  ;;  %v688_v10 = vadd.f32 1.1916082, %v678_v2  ;;  %v718_v11 = vmul.f32 0.34885982, %v558_v60 }
  0xda   : > { %v608_v24 = vadd.f32 2.3753915, %v598_v5  ;;  %v568_v47 = vmul.f32 %v558_v60, %v558_v60  ;;  %v588_v50 = vadd.f32 0.02996348, %v578_v34  ;;  %v648_v51 = vadd.f32 1.5247445, %v638_v35 }
  0xdb   : > { %v298_v12 = vpop.f32.mrf.mxu0  ;;  %v535_v15 = vadd.f32 %v519_v63, %v433_v8  ;;  %v1020_v16 = vpop.eup %1019  ;;  %v767_v19 = vadd.f32 1.0, %v757_v9  ;;  %v728_v20 = vadd.f32 %v718_v11, %v708_v6  ;;  %v698_v25 = vmul.f32 %v688_v10, %v548_v53 }
  0xdc   : > { %v786_v21 = vmul.f32 %v1020_v16, %v666_v13  ;;  %v366_v27 = vadd.f32 %v365_v3, %v298_v12  ;;  %v618_v29 = vmul.f32 %v608_v24, %v558_v60  ;;  %v658_v0 = vmul.f32 %v648_v51, %v568_v47 }
  0xdd   : > { %v549_v23 = vadd.f32 %v1295_v7, %v535_v15  ;;  %1021 = vrcp.f32 %v767_v19  ;;  %v738_v26 = vmul.f32 %v728_v20, %v558_v60 }
  0xde   : > { %796 = vst [vmem:[%s1307_s7 + $0x20] sm:$0xff] %v786_v21  ;;  %v628_v61 = vadd.f32 %v618_v29, %v588_v50 }
  0xdf   : > { %v559_v31 = vmul.f32 %v549_v23, %v549_v23  ;;  %v748_v30 = vadd.f32 %v738_v26, %v698_v25  ;;  %v679_v36 = vmul.f32 4.408118, %v549_v23  ;;  %v709_v38 = vmul.f32 0.91111034, %v549_v23  ;;  %v368_v45 = vpop.f32.mrf.mxu1 }
  0xe0   : > { %v420_v32 = vpop.f32.mrf.mxu2  ;;  %v522_v33 = vpop.f32.mrf.mxu3  ;;  %v599_v41 = vmul.f32 3.0660808, %v549_v23  ;;  %v579_v60 = vmul.f32 0.61690164, %v549_v23  ;;  %v639_v1 = vmul.f32 0.25281987, %v549_v23  ;;  %v668_v8 = vadd.f32 %v658_v0, %v628_v61 }
  0xe1   : > { %v719_v39 = vmul.f32 0.34885982, %v559_v31  ;;  %v758_v40 = vand.u32 2147483647, %v748_v30  ;;  %v689_v42 = vadd.f32 1.1916082, %v679_v36  ;;  %v434_v43 = vadd.f32 %v420_v32, %v366_v27 }
  0xe2   : > { %v609_v57 = vadd.f32 2.3753915, %v599_v41  ;;  %v569_v16 = vmul.f32 %v559_v31, %v559_v31  ;;  %v589_v17 = vadd.f32 0.02996348, %v579_v60  ;;  %v649_v18 = vadd.f32 1.5247445, %v639_v1 }
  0xe3   : > { %v301_v44 = vpop.f32.mrf.mxu0  ;;  %v729_v48 = vadd.f32 %v719_v39, %v709_v38  ;;  %v1022_v49 = vpop.eup %1021  ;;  %v768_v53 = vadd.f32 1.0, %v758_v40  ;;  %v536_v54 = vadd.f32 %v522_v33, %v434_v43  ;;  %v699_v52 = vmul.f32 %v689_v42, %v549_v23 }
  0xe4   : > { %v787_v55 = vmul.f32 %v1022_v49, %v667_v46  ;;  %v369_v58 = vadd.f32 %v368_v45, %v301_v44  ;;  %v619_v9 = vmul.f32 %v609_v57, %v559_v31  ;;  %v659_v26 = vmul.f32 %v649_v18, %v569_v16 }
  0xe5   : > { %v739_v56 = vmul.f32 %v729_v48, %v559_v31  ;;  %1023 = vrcp.f32 %v768_v53  ;;  %v550_v62 = vadd.f32 %v1295_v7, %v536_v54 }
  0xe6   : > { %797 = vst [vmem:[%s1307_s7 + $0x28] sm:$0xff] %v787_v55  ;;  %v629_v22 = vadd.f32 %v619_v9, %v589_v17 }
  0xe7   : > { %v749_v63 = vadd.f32 %v739_v56, %v699_v52  ;;  %v560_v2 = vmul.f32 %v550_v62, %v550_v62  ;;  %v680_v5 = vmul.f32 4.408118, %v550_v62  ;;  %v710_v10 = vmul.f32 0.91111034, %v550_v62 }
  0xe8   : > { %v423_v59 = vpop.f32.mrf.mxu2  ;;  %v525_v3 = vpop.f32.mrf.mxu3  ;;  %v600_v19 = vmul.f32 3.0660808, %v550_v62  ;;  %v580_v32 = vmul.f32 0.61690164, %v550_v62  ;;  %v669_v31 = vadd.f32 %v659_v26, %v629_v22  ;;  %v640_v35 = vmul.f32 0.25281987, %v550_v62 }
  0xe9   : > { %v759_v4 = vand.u32 2147483647, %v749_v63  ;;  %v435_v6 = vadd.f32 %v423_v59, %v369_v58  ;;  %v690_v12 = vadd.f32 1.1916082, %v680_v5  ;;  %v720_v13 = vmul.f32 0.34885982, %v560_v2 }
  0xea   : > { %v610_v27 = vadd.f32 2.3753915, %v600_v19  ;;  %v570_v42 = vmul.f32 %v560_v2, %v560_v2  ;;  %v590_v44 = vadd.f32 0.02996348, %v580_v32  ;;  %v650_v45 = vadd.f32 1.5247445, %v640_v35 }
  0xeb   : > { %v769_v11 = vadd.f32 1.0, %v759_v4  ;;  %v537_v14 = vadd.f32 %v525_v3, %v435_v6  ;;  %v1024_v15 = vpop.eup %1023  ;;  %v730_v21 = vadd.f32 %v720_v13, %v710_v10  ;;  %v700_v23 = vmul.f32 %v690_v12, %v550_v62 }
  0xec   : > { %v788_v20 = vmul.f32 %v1024_v15, %v668_v8  ;;  %v660_v54 = vmul.f32 %v650_v45, %v570_v42 }
  0xed   : > { %1025 = vrcp.f32 %v769_v11  ;;  %v551_v24 = vadd.f32 %v1295_v7, %v537_v14  ;;  %v740_v25 = vmul.f32 %v730_v21, %v560_v2  ;;  %v620_v7 = vmul.f32 %v610_v27, %v560_v2 }
  0xee   : > { %798 = vst [vmem:[%s1307_s7 + $0x30] sm:$0xff] %v788_v20 }
  0xef   : > { %v561_v28 = vmul.f32 %v551_v24, %v551_v24  ;;  %v750_v33 = vadd.f32 %v740_v25, %v700_v23  ;;  %v681_v34 = vmul.f32 4.408118, %v551_v24  ;;  %v711_v30 = vmul.f32 0.91111034, %v551_v24 }
  0xf0   : > { %v601_v38 = vmul.f32 3.0660808, %v551_v24  ;;  %v630_v49 = vadd.f32 %v620_v7, %v590_v44  ;;  %v581_v51 = vmul.f32 0.61690164, %v551_v24  ;;  %v641_v53 = vmul.f32 0.25281987, %v551_v24 }
  0xf1   : > { %v721_v36 = vmul.f32 0.34885982, %v561_v28  ;;  %v760_v29 = vand.u32 2147483647, %v750_v33  ;;  %v691_v39 = vadd.f32 1.1916082, %v681_v34  ;;  %v571_v57 = vmul.f32 %v561_v28, %v561_v28 }
  0xf2   : > { %v611_v48 = vadd.f32 2.3753915, %v601_v38  ;;  %v670_v56 = vadd.f32 %v660_v54, %v630_v49  ;;  %v591_v62 = vadd.f32 0.02996348, %v581_v51  ;;  %v651_v63 = vadd.f32 1.5247445, %v641_v53 }
  0xf3   : > { %v1026_v37 = vpop.eup %1025  ;;  %v731_v41 = vadd.f32 %v721_v36, %v711_v30  ;;  %v770_v43 = vadd.f32 1.0, %v760_v29  ;;  %v701_v46 = vmul.f32 %v691_v39, %v551_v24 }
  0xf4   : > { %v789_v40 = vmul.f32 %v1026_v37, %v669_v31  ;;  %v621_v52 = vmul.f32 %v611_v48, %v561_v28  ;;  %v661_v60 = vmul.f32 %v651_v63, %v571_v57 }
  0xf5   : > { %v741_v47 = vmul.f32 %v731_v41, %v561_v28  ;;  %1027 = vrcp.f32 %v770_v43 }
  0xf6   : > { %799 = vst [vmem:[%s1307_s7 + $0x38] sm:$0xff] %v789_v40  ;;  %v631_v0 = vadd.f32 %v621_v52, %v591_v62 }
  0xf7   : > { %v751_v50 = vadd.f32 %v741_v47, %v701_v46 }
  0xf8   : > { %v671_v1 = vadd.f32 %v661_v60, %v631_v0 }
  0xf9   : > { %v761_v55 = vand.u32 2147483647, %v751_v50 }
  0xfb   : > { %v771_v58 = vadd.f32 1.0, %v761_v55  ;;  %v1028_v61 = vpop.eup %1027 }
  0xfc   : > { %v790_v59 = vmul.f32 %v1028_v61, %v670_v56 }
  0xfd   : > { %1029 = vrcp.f32 %v771_v58 }
  0xfe   : > { %800 = vst [vmem:[%s1307_s7 + $0x40] sm:$0xff] %v790_v59 }
 0x103   : > { %v1030_v2 = vpop.eup %1029 }
 0x104   : > { %v791_v3 = vmul.f32 %v1030_v2, %v671_v1 }
 0x106   : > { %801 = vst [vmem:[%s1307_s7 + $0x48] sm:$0xff] %v791_v3 }
 0x107   : > { %1058 = shalt.err (!%p1055_p5)
}
 0x108   : > { %s1111_s4 = smov 128   ;;  %s1112_s5 = smov 8  }
 0x109   : > { %953 = dma.vmem_to_hbm [thread:$0]  (%p1173_p4), %s818_s15, 1280, %s820_s18, %s803_s19, %s1111_s4, %s1111_s4, %s1112_s5  }
 0x10a PF: > { %p959_p6 = scmp.ge.s32.totalorder %s1109_s17, 2  ;;  %s834_s6 = sand.u32 1, %s1089_s12  }
 0x10b   : > { %s835_s7 = scalar_lea.sflag [#allocation3], %s834_s6 }
 0x10c   : > { %p956_p7 = pnand %p959_p6, %p1180_p8 }
 0x10e   : > { %p957_p9 = pneg %p956_p7 }
 0x110   : > { %1084 = dma.done.wait (%p957_p9), %s835_s7, 1280  }
 0x111   : > { %1086 = vsyncadd (%p957_p9), %s835_s7, 4294966016  ;;  %s16_s17 = sadd.s32 1, %s1109_s17   ;;  %s1370_s12 = smov %s1093_s13 }
 0x112   : > { %p13_p10 = scmp.ge.s32.totalorder %s16_s17, 4   ;;  %s1371_s13 = smov %s1097_s14 }
 0x113   : > { %s1372_s14 = smov %s1186_s25  ;;  %s1373_s15 = smov %s1105_s16 }
 0x114   : > { %s1374_s16 = smov %s1376_s20  ;;  %15 = sbr.rel (!%p13_p10) target bundleno = 4 (0x4), region = 71 }
 0x119   :  { %841 = vsyncpa [#allocation3], 1 }
 0x11a   :  { %843 = vsyncpa [#allocation3 + $0x1], 1 }

</bundles_post_ra>
